<compile_context>
chip_gen: v7x
topology: tpu7x:2x2x1
jax: 0.10.0
libtpu: 0.0.40
codegen_flags: <defaults>
</compile_context>

<pallas_src>
import functools

import numpy as np
import jax
import jax.numpy as jnp
from jax.experimental import pallas as pl
from jax.experimental.pallas import tpu as pltpu


# --------------------------------------------------------------------------------------
# tiling helpers
# --------------------------------------------------------------------------------------
def _row_tile(m, cap=512):
    """Largest divisor of m that is <= cap and a multiple of 8 (or m itself)."""
    for t in range(min(m, cap), 0, -1):
        if m % t == 0 and (t % 8 == 0 or t == m):
            return t
    return m


# --------------------------------------------------------------------------------------
# in-kernel math helpers
# --------------------------------------------------------------------------------------
def _erf(x):
    # Abramowitz-Stegun 7.1.26 rational approximation, |err| < 1.5e-7.
    # Used because lax.erf has no guaranteed Mosaic lowering; gives exact-GELU parity
    # with PyTorch nn.GELU() well below the 1e-3 tolerance.
    a1, a2, a3, a4, a5 = 0.254829592, -0.284496736, 1.421413741, -1.453152027, 1.061405429
    p = 0.3275911
    ax = jnp.abs(x)
    t = 1.0 / (1.0 + p * ax)
    poly = ((((a5 * t + a4) * t + a3) * t + a2) * t + a1) * t
    y = 1.0 - poly * jnp.exp(-ax * ax)
    return jnp.where(x >= 0, y, -y)


def _gelu_exact(x):
    return 0.5 * x * (1.0 + _erf(x * 0.7071067811865476))


def _ln(x, g, b, eps):
    mu = jnp.mean(x, axis=-1, keepdims=True)
    var = jnp.mean(jnp.square(x - mu), axis=-1, keepdims=True)
    return (x - mu) * jax.lax.rsqrt(var + eps) * g + b


# --------------------------------------------------------------------------------------
# kernels
# --------------------------------------------------------------------------------------
def _layernorm_kernel(x_ref, g_ref, b_ref, o_ref, *, eps):
    x = x_ref[...].astype(jnp.float32)
    o_ref[...] = _ln(x, g_ref[...].astype(jnp.float32),
                     b_ref[...].astype(jnp.float32), eps).astype(o_ref.dtype)


def _ln_linear_kernel(x_ref, g_ref, b_ref, w_ref, bias_ref, o_ref, *, eps, apply_ln):
    x = x_ref[...].astype(jnp.float32)
    if apply_ln:
        x = _ln(x, g_ref[...].astype(jnp.float32), b_ref[...].astype(jnp.float32), eps)
    y = jnp.dot(x, w_ref[...].astype(jnp.float32),
                preferred_element_type=jnp.float32) + bias_ref[...].astype(jnp.float32)
    o_ref[...] = y.astype(o_ref.dtype)


def _window_attn_kernel(qkv_ref, bias_ref, *rest, scale, nh, use_mask):
    if use_mask:
        mask_ref, o_ref = rest
    else:
        (o_ref,) = rest

    qkv = qkv_ref[0].astype(jnp.float32)            # (nW, n, 3C)
    n_w, n, c3 = qkv.shape
    c = c3 // 3
    dh = c // nh
    bias = bias_ref[...].astype(jnp.float32)        # (nh, n, n)
    mask = mask_ref[...].astype(jnp.float32) if use_mask else None   # (nW, n, n)

    outs = []
    for h in range(nh):                             # static unroll over heads
        q = qkv[:, :, h * dh:(h + 1) * dh] * scale            # (nW, n, dh)
        k = qkv[:, :, c + h * dh:c + (h + 1) * dh]             # (nW, n, dh)
        v = qkv[:, :, 2 * c + h * dh:2 * c + (h + 1) * dh]     # (nW, n, dh)
        # batched over windows: (nW, n, dh) x (nW, n, dh) -> (nW, n, n)
        attn = jax.lax.dot_general(q, k, (((2,), (2,)), ((0,), (0,))),
                                   preferred_element_type=jnp.float32)
        attn = attn + bias[h][None]
        if use_mask:
            attn = attn + mask
        attn = attn - jnp.max(attn, axis=-1, keepdims=True)
        p = jnp.exp(attn)
        p = p * pl.reciprocal(jnp.sum(p, axis=-1, keepdims=True), approx=True)
        outs.append(jax.lax.dot_general(p, v, (((2,), (1,)), ((0,), (0,))),
                                        preferred_element_type=jnp.float32))
    # heads concatenated along the channel axis -> lane-dense (nW, n, C) store
    o_ref[0] = jnp.concatenate(outs, axis=-1).astype(o_ref.dtype)


def _proj_res_kernel(scale_ref, y_ref, sc_ref, w_ref, b_ref, o_ref):
    y = jnp.dot(y_ref[0].astype(jnp.float32), w_ref[...].astype(jnp.float32),
                preferred_element_type=jnp.float32) + b_ref[...].astype(jnp.float32)
    s = scale_ref[pl.program_id(0)]                  # per-sample DropPath scale (SMEM)
    o_ref[0] = (sc_ref[0].astype(jnp.float32) + s * y).astype(o_ref.dtype)


def _ln_mlp_res_kernel(scale_ref, x_ref, g_ref, bb_ref, w1_ref, b1_ref, w2_ref, b2_ref,
                       o_ref, *, eps):
    x = x_ref[0].astype(jnp.float32)                 # (tl, C); also the residual input
    xn = _ln(x, g_ref[...].astype(jnp.float32), bb_ref[...].astype(jnp.float32), eps)
    h = jnp.dot(xn, w1_ref[...].astype(jnp.float32),
                preferred_element_type=jnp.float32) + b1_ref[...].astype(jnp.float32)
    h = _gelu_exact(h)
    y = jnp.dot(h, w2_ref[...].astype(jnp.float32),
                preferred_element_type=jnp.float32) + b2_ref[...].astype(jnp.float32)
    s = scale_ref[pl.program_id(0)]
    o_ref[0] = (x + s * y).astype(o_ref.dtype)


# --------------------------------------------------------------------------------------
# pallas_call wrappers
# --------------------------------------------------------------------------------------
def layernorm(x, gamma, beta, eps=1e-5):
    m, c = x.shape
    tm = _row_tile(m)
    return pl.pallas_call(
        functools.partial(_layernorm_kernel, eps=eps),
        out_shape=jax.ShapeDtypeStruct((m, c), x.dtype),
        grid=(m // tm,),
        in_specs=[pl.BlockSpec((tm, c), lambda i: (i, 0)),
                  pl.BlockSpec((1, c), lambda i: (0, 0)),
                  pl.BlockSpec((1, c), lambda i: (0, 0))],
        out_specs=pl.BlockSpec((tm, c), lambda i: (i, 0)),
        compiler_params=pltpu.CompilerParams(dimension_semantics=("parallel",)),
    )(x, gamma.reshape(1, c), beta.reshape(1, c))


def ln_linear(x, gamma, beta, w, bias, *, apply_ln=True, eps=1e-5):
    """Fused LayerNorm + x @ W + b  (LN skipped when apply_ln=False)."""
    m, c = x.shape
    n = w.shape[1]
    tm = _row_tile(m)
    return pl.pallas_call(
        functools.partial(_ln_linear_kernel, eps=eps, apply_ln=apply_ln),
        out_shape=jax.ShapeDtypeStruct((m, n), x.dtype),
        grid=(m // tm,),
        in_specs=[pl.BlockSpec((tm, c), lambda i: (i, 0)),
                  pl.BlockSpec((1, c), lambda i: (0, 0)),
                  pl.BlockSpec((1, c), lambda i: (0, 0)),
                  pl.BlockSpec((c, n), lambda i: (0, 0)),
                  pl.BlockSpec((1, n), lambda i: (0, 0))],
        out_specs=pl.BlockSpec((tm, n), lambda i: (i, 0)),
        compiler_params=pltpu.CompilerParams(dimension_semantics=("parallel",)),
    )(x, gamma.reshape(1, c), beta.reshape(1, c), w, bias.reshape(1, n))


def window_attention(qkv, rel_bias, mask, scale, nh):
    """qkv: (B, nW, n, 3C) head-interleaved; returns (B, nW, n, C) heads-concatenated.

    One grid step per image processes all of that image's windows and heads, so the
    per-window mask aligns as mask[window_in_image]; no per-(window,head) micro-steps.
    """
    b, n_w, n, c3 = qkv.shape
    c = c3 // 3
    use_mask = mask is not None
    kernel = functools.partial(_window_attn_kernel, scale=scale, nh=nh, use_mask=use_mask)
    in_specs = [pl.BlockSpec((1, n_w, n, c3), lambda i: (i, 0, 0, 0)),
                pl.BlockSpec((nh, n, n), lambda i: (0, 0, 0))]
    args = [qkv, rel_bias]
    if use_mask:
        in_specs.append(pl.BlockSpec((n_w, n, n), lambda i: (0, 0, 0)))
        args.append(mask.astype(jnp.float32))
    return pl.pallas_call(
        kernel,
        out_shape=jax.ShapeDtypeStruct((b, n_w, n, c), qkv.dtype),
        grid=(b,),
        in_specs=in_specs,
        out_specs=pl.BlockSpec((1, n_w, n, c), lambda i: (i, 0, 0, 0)),
        compiler_params=pltpu.CompilerParams(dimension_semantics=("parallel",)),
    )(*args)


def proj_residual(y, shortcut, w, bias, dp_scale):
    """out = shortcut + dp_scale[b] * (y @ W + b)   — fused proj + residual + DropPath."""
    b, l, c = y.shape
    tl = _row_tile(l)
    return pl.pallas_call(
        _proj_res_kernel,
        out_shape=jax.ShapeDtypeStruct((b, l, c), shortcut.dtype),
        grid_spec=pltpu.PrefetchScalarGridSpec(
            num_scalar_prefetch=1,
            grid=(b, l // tl),
            in_specs=[pl.BlockSpec((1, tl, c), lambda i, t, s: (i, t, 0)),
                      pl.BlockSpec((1, tl, c), lambda i, t, s: (i, t, 0)),
                      pl.BlockSpec((c, c), lambda i, t, s: (0, 0)),
                      pl.BlockSpec((1, c), lambda i, t, s: (0, 0))],
            out_specs=pl.BlockSpec((1, tl, c), lambda i, t, s: (i, t, 0)),
        ),
        compiler_params=pltpu.CompilerParams(
            dimension_semantics=("parallel", "parallel")),
    )(dp_scale.astype(jnp.float32), y, shortcut, w, bias.reshape(1, c))


def ln_mlp_residual(x, gamma, beta, w1, b1, w2, b2, dp_scale, eps=1e-5):
    """out = x + dp_scale[b] * fc2(GELU(fc1(LN(x))))   — fully fused MLP branch."""
    b, l, c = x.shape
    hdim = w1.shape[1]
    tl = _row_tile(l)
    # TODO(synk): for real Swin sizes (C=768, hidden=3072) on v7x (64 MiB VMEM), add a
    #             grid axis over the hidden dim with a VMEM accumulator instead of full
    #             double-buffered weight blocks.
    return pl.pallas_call(
        functools.partial(_ln_mlp_res_kernel, eps=eps),
        out_shape=jax.ShapeDtypeStruct((b, l, c), x.dtype),
        grid_spec=pltpu.PrefetchScalarGridSpec(
            num_scalar_prefetch=1,
            grid=(b, l // tl),
            in_specs=[pl.BlockSpec((1, tl, c), lambda i, t, s: (i, t, 0)),
                      pl.BlockSpec((1, c), lambda i, t, s: (0, 0)),
                      pl.BlockSpec((1, c), lambda i, t, s: (0, 0)),
                      pl.BlockSpec((c, hdim), lambda i, t, s: (0, 0)),
                      pl.BlockSpec((1, hdim), lambda i, t, s: (0, 0)),
                      pl.BlockSpec((hdim, c), lambda i, t, s: (0, 0)),
                      pl.BlockSpec((1, c), lambda i, t, s: (0, 0))],
            out_specs=pl.BlockSpec((1, tl, c), lambda i, t, s: (i, t, 0)),
        ),
        compiler_params=pltpu.CompilerParams(
            dimension_semantics=("parallel", "parallel")),
    )(dp_scale.astype(jnp.float32), x, gamma.reshape(1, c), beta.reshape(1, c),
      w1, b1.reshape(1, hdim), w2, b2.reshape(1, c))


# --------------------------------------------------------------------------------------
# SwinTransformerBlock forward (Pallas) — mirrors the PyTorch reference
# --------------------------------------------------------------------------------------
def swin_block_forward(params, x, h, w, attn_mask, dp_scale1, dp_scale2, cfg):
    b, l, c = x.shape
    ws, ss, nh = cfg["window_size"], cfg["shift_size"], cfg["num_heads"]
    dh = c // nh
    n = ws * ws
    assert l == h * w

    shortcut = x
    h_eff, w_eff = max(h, ws), max(w, ws)
    needs_pad = (h_eff, w_eff) != (h, w)

    if needs_pad:
        # zero padding is inserted AFTER norm1, so LN cannot be fused into qkv here
        xn = layernorm(x.reshape(b * l, c), params["norm1_g"], params["norm1_b"])
        xn = xn.reshape(b, h, w, c)
        xn = jnp.pad(xn, ((0, 0), (0, h_eff - h), (0, w_eff - w), (0, 0)))
        fuse_ln = False
    else:
        xn = x.reshape(b, h, w, c)
        fuse_ln = True

    if ss > 0:
        xn = jnp.roll(xn, (-ss, -ss), axis=(1, 2))

    # window partition -> flat tokens in (B, nW, n) order
    nwh, nww = h_eff // ws, w_eff // ws
    n_win = nwh * nww
    xw = xn.reshape(b, nwh, ws, nww, ws, c).transpose(0, 1, 3, 2, 4, 5)
    xw = xw.reshape(b * n_win * n, c)

    # fused LayerNorm(norm1) + qkv projection; kept as (B, nW, n, 3C), no 5-D transpose
    qkv = ln_linear(xw, params["norm1_g"], params["norm1_b"],
                    params["qkv_w"], params["qkv_b"], apply_ln=fuse_ln)
    qkv = qkv.reshape(b, n_win, n, 3 * c)

    # window attention: all windows + heads of one image per grid step
    attn_out = window_attention(qkv, params["rel_bias"], attn_mask, dh ** -0.5, nh)

    # window reverse / un-shift / un-pad (output projection is per-token and commutes
    # with this permutation, so it is deferred into the fused proj+residual kernel)
    xr = attn_out.reshape(b, nwh, nww, ws, ws, c).transpose(0, 1, 3, 2, 4, 5)
    xr = xr.reshape(b, h_eff, w_eff, c)
    if ss > 0:
        xr = jnp.roll(xr, (ss, ss), axis=(1, 2))
    xr = xr[:, :h, :w, :].reshape(b, l, c)

    # fused: attn output projection + residual + DropPath
    x1 = proj_residual(xr, shortcut, params["proj_w"], params["proj_b"], dp_scale1)

    # fused: norm2 + MLP (fc1 -> exact GELU -> fc2) + residual + DropPath
    return ln_mlp_residual(x1, params["norm2_g"], params["norm2_b"],
                           params["fc1_w"], params["fc1_b"],
                           params["fc2_w"], params["fc2_b"], dp_scale2)


# --------------------------------------------------------------------------------------
# pure-JAX reference (numeric parity check only)
# --------------------------------------------------------------------------------------
def _ref_layernorm(x, g, b, eps=1e-5):
    mu = jnp.mean(x, axis=-1, keepdims=True)
    var = jnp.mean(jnp.square(x - mu), axis=-1, keepdims=True)
    return (x - mu) * jax.lax.rsqrt(var + eps) * g + b


def swin_block_reference(params, x, h, w, attn_mask, dp1, dp2, cfg):
    b, l, c = x.shape
    ws, ss, nh = cfg["window_size"], cfg["shift_size"], cfg["num_heads"]
    dh = c // nh
    n = ws * ws
    shortcut = x
    xn = _ref_layernorm(x, params["norm1_g"], params["norm1_b"]).reshape(b, h, w, c)
    h_eff, w_eff = max(h, ws), max(w, ws)
    if (h_eff, w_eff) != (h, w):
        xn = jnp.pad(xn, ((0, 0), (0, h_eff - h), (0, w_eff - w), (0, 0)))
    if ss > 0:
        xn = jnp.roll(xn, (-ss, -ss), axis=(1, 2))
    nwh, nww = h_eff // ws, w_eff // ws
    xw = xn.reshape(b, nwh, ws, nww, ws, c).transpose(0, 1, 3, 2, 4, 5).reshape(-1, n, c)
    bw = xw.shape[0]
    qkv = (xw @ params["qkv_w"] + params["qkv_b"]).reshape(bw, n, 3, nh, dh)
    qkv = qkv.transpose(2, 0, 3, 1, 4)
    q, k, v = qkv[0], qkv[1], qkv[2]
    attn = jnp.einsum("bhnd,bhmd->bhnm", q * dh ** -0.5, k) + params["rel_bias"][None]
    if attn_mask is not None:
        n_w = attn_mask.shape[0]
        attn = attn + attn_mask[jnp.arange(bw) % n_w][:, None]
    attn = jax.nn.softmax(attn, axis=-1)
    out = jnp.einsum("bhnm,bhmd->bhnd", attn, v).transpose(0, 2, 1, 3).reshape(bw, n, c)
    out = out @ params["proj_w"] + params["proj_b"]
    xr = out.reshape(b, nwh, nww, ws, ws, c).transpose(0, 1, 3, 2, 4, 5)
    xr = xr.reshape(b, h_eff, w_eff, c)
    if ss > 0:
        xr = jnp.roll(xr, (ss, ss), axis=(1, 2))
    xr = xr[:, :h, :w, :].reshape(b, l, c)
    x1 = shortcut + dp1[:, None, None] * xr
    xn2 = _ref_layernorm(x1, params["norm2_g"], params["norm2_b"])
    mlp = jax.nn.gelu(xn2 @ params["fc1_w"] + params["fc1_b"], approximate=False)
    mlp = mlp @ params["fc2_w"] + params["fc2_b"]
    return x1 + dp2[:, None, None] * mlp


# --------------------------------------------------------------------------------------
# constant builders (same math as the PyTorch buffers / Swin mask construction)
# --------------------------------------------------------------------------------------
def _relative_position_index(ws):
    coords = np.stack(np.meshgrid(np.arange(ws), np.arange(ws), indexing="ij"))
    flat = coords.reshape(2, -1)
    rel = (flat[:, :, None] - flat[:, None, :]).transpose(1, 2, 0).astype(np.int64)
    rel[:, :, 0] += ws - 1
    rel[:, :, 1] += ws - 1
    rel[:, :, 0] *= 2 * ws - 1
    return jnp.asarray(rel.sum(-1), jnp.int32)


def _build_attn_mask(h, w, ws, ss):
    if ss == 0:
        return None
    hp, wp = max(h, ws), max(w, ws)
    img = np.zeros((hp, wp), np.float32)
    slices = (slice(0, -ws), slice(-ws, -ss), slice(-ss, None))
    cnt = 0
    for hs in slices:
        for wsl in slices:
            img[hs, wsl] = cnt
            cnt += 1
    win = img.reshape(hp // ws, ws, wp // ws, ws).transpose(0, 2, 1, 3).reshape(-1, ws * ws)
    mask = win[:, None, :] - win[:, :, None]
    return jnp.asarray(np.where(mask != 0, -100.0, 0.0).astype(np.float32))


# --------------------------------------------------------------------------------------
if __name__ == "__main__":
    # small Swin-like config: dim=32, 4 heads, 8x8 feature map, 4x4 windows, shift=2
    B, H, W = 2, 8, 8
    DIM, NUM_HEADS, WINDOW_SIZE, SHIFT_SIZE = 32, 4, 4, 2
    MLP_RATIO = 4.0
    DROP_PATH = 0.1                       # training-mode DropPath exercised
    L = H * W
    N = WINDOW_SIZE * WINDOW_SIZE
    HIDDEN = int(DIM * MLP_RATIO)

    key = jax.random.PRNGKey(0)
    k_x, k_qkv, k_tab, k_proj, k_fc1, k_fc2, k_dp = jax.random.split(key, 7)

    x = jax.random.normal(k_x, (B, L, DIM), jnp.float32)

    rel_pos_table = 0.02 * jax.random.normal(
        k_tab, ((2 * WINDOW_SIZE - 1) ** 2, NUM_HEADS), jnp.float32)
    rel_pos_index = _relative_position_index(WINDOW_SIZE)
    # relative-position-bias gather hoisted out of the forward (constant per layer)
    rel_bias = rel_pos_table[rel_pos_index.reshape(-1)]
    rel_bias = rel_bias.reshape(N, N, NUM_HEADS).transpose(2, 0, 1)   # (nh, N, N)

    params = dict(
        norm1_g=jnp.ones((DIM,), jnp.float32),
        norm1_b=jnp.zeros((DIM,), jnp.float32),
        qkv_w=0.05 * jax.random.normal(k_qkv, (DIM, 3 * DIM), jnp.float32),
        qkv_b=jnp.zeros((3 * DIM,), jnp.float32),
        rel_bias=rel_bias,
        proj_w=0.05 * jax.random.normal(k_proj, (DIM, DIM), jnp.float32),
        proj_b=jnp.zeros((DIM,), jnp.float32),
        norm2_g=jnp.ones((DIM,), jnp.float32),
        norm2_b=jnp.zeros((DIM,), jnp.float32),
        fc1_w=0.05 * jax.random.normal(k_fc1, (DIM, HIDDEN), jnp.float32),
        fc1_b=jnp.zeros((HIDDEN,), jnp.float32),
        fc2_w=0.05 * jax.random.normal(k_fc2, (HIDDEN, DIM), jnp.float32),
        fc2_b=jnp.zeros((DIM,), jnp.float32),
    )

    attn_mask = _build_attn_mask(H, W, WINDOW_SIZE, SHIFT_SIZE)       # (nW, N, N)

    # DropPath (training=True): scale = floor(keep + U[0,1)) / keep, one draw per branch
    keep = 1.0 - DROP_PATH
    kd1, kd2 = jax.random.split(k_dp)
    dp_scale1 = jnp.floor(keep + jax.random.uniform(kd1, (B,), jnp.float32)) / keep
    dp_scale2 = jnp.floor(keep + jax.random.uniform(kd2, (B,), jnp.float32)) / keep

    cfg = dict(window_size=WINDOW_SIZE, shift_size=SHIFT_SIZE, num_heads=NUM_HEADS)

    out = swin_block_forward(params, x, H, W, attn_mask, dp_scale1, dp_scale2, cfg)
    out = jax.block_until_ready(out)

    ref = swin_block_reference(params, x, H, W, attn_mask, dp_scale1, dp_scale2, cfg)
    ref = jax.block_until_ready(ref)

    assert out.shape == (B, L, DIM)
    assert bool(jnp.isfinite(out).all())
    max_err = float(jnp.max(jnp.abs(out - ref)))
    assert max_err < 1e-3, f"Pallas output mismatch vs reference: {max_err}"

    print("KERNEL_OK")
</pallas_src>

<mosaic_0001>
module attributes {stable_mosaic.version = 11 : i64} {
  func.func @_ln_linear_kernel(%arg0: i32, %arg1: memref<128x32xf32, #tpu.memory_space<vmem>>, %arg2: memref<1x32xf32, #tpu.memory_space<vmem>>, %arg3: memref<1x32xf32, #tpu.memory_space<vmem>>, %arg4: memref<32x96xf32, #tpu.memory_space<vmem>>, %arg5: memref<1x96xf32, #tpu.memory_space<vmem>>, %arg6: memref<128x96xf32, #tpu.memory_space<vmem>>) attributes {dimension_semantics = [#tpu.dimension_semantics<parallel>], iteration_bounds = array<i64: 1>, scalar_prefetch = 0 : i64, scratch_operands = 0 : i64, tpu.core_type = #tpu.core_type<tc>, window_params = [{transform_indices = @transform_0, window_bounds = array<i64: 128, 32>}, {pipeline_mode = #tpu.pipeline_mode<synchronous>, transform_indices = @transform_1, window_bounds = array<i64: 1, 32>}, {pipeline_mode = #tpu.pipeline_mode<synchronous>, transform_indices = @transform_2, window_bounds = array<i64: 1, 32>}, {pipeline_mode = #tpu.pipeline_mode<synchronous>, transform_indices = @transform_3, window_bounds = array<i64: 32, 96>}, {pipeline_mode = #tpu.pipeline_mode<synchronous>, transform_indices = @transform_4, window_bounds = array<i64: 1, 96>}, {transform_indices = @transform_5, window_bounds = array<i64: 128, 96>}]} {
    %c0 = arith.constant 0 : index
    %c0_0 = arith.constant 0 : index
    %0 = vector.load %arg1[%c0, %c0_0] : memref<128x32xf32, #tpu.memory_space<vmem>>, vector<128x32xf32>
    %c0_1 = arith.constant 0 : index
    %c0_2 = arith.constant 0 : index
    %1 = vector.load %arg2[%c0_1, %c0_2] : memref<1x32xf32, #tpu.memory_space<vmem>>, vector<1x32xf32>
    %c0_3 = arith.constant 0 : index
    %c0_4 = arith.constant 0 : index
    %2 = vector.load %arg3[%c0_3, %c0_4] : memref<1x32xf32, #tpu.memory_space<vmem>>, vector<1x32xf32>
    %cst = arith.constant dense<0.000000e+00> : vector<128xf32>
    %3 = vector.multi_reduction <add>, %0, %cst [1] : vector<128x32xf32> to vector<128xf32>
    %4 = vector.shape_cast %3 : vector<128xf32> to vector<128x1xf32>
    %cst_5 = arith.constant 3.200000e+01 : f32
    %5 = vector.broadcast %cst_5 : f32 to vector<128x1xf32>
    %6 = arith.divf %4, %5 : vector<128x1xf32>
    %7 = vector.broadcast %6 : vector<128x1xf32> to vector<128x32xf32>
    %8 = arith.subf %0, %7 : vector<128x32xf32>
    %9 = arith.mulf %8, %8 : vector<128x32xf32>
    %cst_6 = arith.constant dense<0.000000e+00> : vector<128xf32>
    %10 = vector.multi_reduction <add>, %9, %cst_6 [1] : vector<128x32xf32> to vector<128xf32>
    %11 = vector.shape_cast %10 : vector<128xf32> to vector<128x1xf32>
    %cst_7 = arith.constant 3.200000e+01 : f32
    %12 = vector.broadcast %cst_7 : f32 to vector<128x1xf32>
    %13 = arith.divf %11, %12 : vector<128x1xf32>
    %14 = vector.broadcast %6 : vector<128x1xf32> to vector<128x32xf32>
    %15 = arith.subf %0, %14 : vector<128x32xf32>
    %cst_8 = arith.constant 9.99999974E-6 : f32
    %16 = vector.broadcast %cst_8 : f32 to vector<128x1xf32>
    %17 = arith.addf %13, %16 : vector<128x1xf32>
    %18 = math.rsqrt %17 : vector<128x1xf32>
    %19 = vector.broadcast %18 : vector<128x1xf32> to vector<128x32xf32>
    %20 = arith.mulf %15, %19 : vector<128x32xf32>
    %21 = vector.broadcast %1 : vector<1x32xf32> to vector<128x32xf32>
    %22 = arith.mulf %20, %21 : vector<128x32xf32>
    %23 = vector.broadcast %2 : vector<1x32xf32> to vector<128x32xf32>
    %24 = arith.addf %22, %23 : vector<128x32xf32>
    %c0_9 = arith.constant 0 : index
    %c0_10 = arith.constant 0 : index
    %25 = vector.load %arg4[%c0_9, %c0_10] : memref<32x96xf32, #tpu.memory_space<vmem>>, vector<32x96xf32>
    %cst_11 = arith.constant dense<0.000000e+00> : vector<128x96xf32>
    %26 = tpu.matmul %24, %25, %cst_11 {dimension_numbers = #tpu.dot_dimension_numbers<[1], [0], [0], [1], [0, 0, 1, 1], [], []>} : vector<128x32xf32>, vector<32x96xf32>, vector<128x96xf32> -> vector<128x96xf32>
    %c0_12 = arith.constant 0 : index
    %c0_13 = arith.constant 0 : index
    %27 = vector.load %arg5[%c0_12, %c0_13] : memref<1x96xf32, #tpu.memory_space<vmem>>, vector<1x96xf32>
    %28 = vector.broadcast %27 : vector<1x96xf32> to vector<128x96xf32>
    %29 = arith.addf %26, %28 : vector<128x96xf32>
    %c0_14 = arith.constant 0 : index
    %c0_15 = arith.constant 0 : index
    %30 = vector.load %arg6[%c0_14, %c0_15] : memref<128x96xf32, #tpu.memory_space<vmem>>, vector<128x96xf32>
    tpu.vector_store %arg6[%c0_14, %c0_15], %29 {strides = array<i32>} : memref<128x96xf32, #tpu.memory_space<vmem>>, vector<128x96xf32>,
    return
  }
  func.func @transform_0(%arg0: i32) -> (i32, i32) {
    %c0_i32 = arith.constant 0 : i32
    %c0_i32_0 = arith.constant 0 : i32
    return %arg0, %c0_i32 : i32, i32
  }
  func.func @transform_1(%arg0: i32) -> (i32, i32) {
    %c0_i32 = arith.constant 0 : i32
    %c0_i32_0 = arith.constant 0 : i32
    %c0_i32_1 = arith.constant 0 : i32
    return %c0_i32, %c0_i32_0 : i32, i32
  }
  func.func @transform_2(%arg0: i32) -> (i32, i32) {
    %c0_i32 = arith.constant 0 : i32
    %c0_i32_0 = arith.constant 0 : i32
    %c0_i32_1 = arith.constant 0 : i32
    return %c0_i32, %c0_i32_0 : i32, i32
  }
  func.func @transform_3(%arg0: i32) -> (i32, i32) {
    %c0_i32 = arith.constant 0 : i32
    %c0_i32_0 = arith.constant 0 : i32
    %c0_i32_1 = arith.constant 0 : i32
    return %c0_i32, %c0_i32_0 : i32, i32
  }
  func.func @transform_4(%arg0: i32) -> (i32, i32) {
    %c0_i32 = arith.constant 0 : i32
    %c0_i32_0 = arith.constant 0 : i32
    %c0_i32_1 = arith.constant 0 : i32
    return %c0_i32, %c0_i32_0 : i32, i32
  }
  func.func @transform_5(%arg0: i32) -> (i32, i32) {
    %c0_i32 = arith.constant 0 : i32
    %c0_i32_0 = arith.constant 0 : i32
    return %arg0, %c0_i32 : i32, i32
  }
}

</mosaic_0001>

<bundles_post_ra>
// kernel: tpu_custom_call.1
= control target key start
LH: loop header
LB: loop body
LE: loop exit
PB: predicated region body
PF: predicated region fallthrough
CT: control target
= control target key end

     0   :  { %vm38_vm0 = vcmask 261120   ;;  %vm496_vm1 = vcmask 785408   ;;  %s999_s0 = inlined_call_operand.vmem [shape: f32[128,32], index: 0, kind: input, shape index: {}]   ;;  %s1000_s3 = inlined_call_operand.vmem [shape: f32[32,96], index: 3, kind: input, shape index: {}]   ;;  %s1001_s1 = inlined_call_operand.vmem [shape: f32[1,32], index: 1, kind: input, shape index: {}]   ;;  %s1002_s2 = inlined_call_operand.vmem [shape: f32[1,32], index: 2, kind: input, shape index: {}]   ;;  %s1003_s4 = inlined_call_operand.vmem [shape: f32[1,96], index: 4, kind: input, shape index: {}]   ;;  %s1004_s5 = inlined_call_operand.vmem [shape: f32[128,96], index: 5, kind: output, shape index: {}]  }
   0x1   :  { %v20_v0 = vld [vmem:[%s999_s0] sm:$0xff]  ;;  %v21_v1 = vld [vmem:[%s999_s0 + $0x8] sm:$0xff]  ;;  %v22_v8 = vld [vmem:[%s999_s0 + $0x10] sm:$0xff] }
   0x2   :  { %v28_v2 = vld [vmem:[%s999_s0 + $0x40] sm:$0xff]  ;;  %v39_v3 = vsel %vm38_vm0, %v20_v0, 0.0  ;;  %v42_v4 = vsel %vm38_vm0, %v21_v1, 0.0  ;;  %v29_v5 = vld [vmem:[%s999_s0 + $0x48] sm:$0xff]  ;;  %v30_v9 = vld [vmem:[%s999_s0 + $0x50] sm:$0xff]  ;;  %v45_v10 = vsel %vm38_vm0, %v22_v8, 0.0 }
   0x3   :  { %40 = vadd.xlane.f32.xlu0 %v39_v3  ;;  %43 = vadd.xlane.f32.xlu1 %v42_v4  ;;  %v63_v6 = vsel %vm38_vm0, %v28_v2, 0.0  ;;  %v66_v7 = vsel %vm38_vm0, %v29_v5, 0.0  ;;  %v69_v11 = vsel %vm38_vm0, %v30_v9, 0.0  ;;  %v689_v12 = vld [vmem:[%s999_s0 + $0x18] sm:$0xff]  ;;  %v703_v16 = vld [vmem:[%s999_s0 + $0x20] sm:$0xff]  ;;  %v717_v20 = vld [vmem:[%s999_s0 + $0x28] sm:$0xff] }
   0x4   :  { %v694_v13 = vld [vmem:[%s999_s0 + $0x58] sm:$0xff]  ;;  %v48_v14 = vsel %vm38_vm0, %v689_v12, 0.0  ;;  %v708_v17 = vld [vmem:[%s999_s0 + $0x60] sm:$0xff]  ;;  %v51_v18 = vsel %vm38_vm0, %v703_v16, 0.0  ;;  %v722_v21 = vld [vmem:[%s999_s0 + $0x68] sm:$0xff]  ;;  %v54_v22 = vsel %vm38_vm0, %v717_v20, 0.0 }
   0x5   :  { %v72_v15 = vsel %vm38_vm0, %v694_v13, 0.0  ;;  %v75_v19 = vsel %vm38_vm0, %v708_v17, 0.0  ;;  %v78_v23 = vsel %vm38_vm0, %v722_v21, 0.0  ;;  %v731_v24 = vld [vmem:[%s999_s0 + $0x30] sm:$0xff]  ;;  %v745_v28 = vld [vmem:[%s999_s0 + $0x38] sm:$0xff] }
   0x6   :  { %v736_v25 = vld [vmem:[%s999_s0 + $0x70] sm:$0xff]  ;;  %v57_v26 = vsel %vm38_vm0, %v731_v24, 0.0  ;;  %v750_v29 = vld [vmem:[%s999_s0 + $0x78] sm:$0xff]  ;;  %v60_v30 = vsel %vm38_vm0, %v745_v28, 0.0 }
   0x7   :  { %64 = vadd.xlane.f32.xlu0 %v63_v6  ;;  %67 = vadd.xlane.f32.xlu1 %v66_v7  ;;  %v81_v27 = vsel %vm38_vm0, %v736_v25, 0.0  ;;  %v84_v31 = vsel %vm38_vm0, %v750_v29, 0.0 }
   0xb   :  { %46 = vadd.xlane.f32.xlu0 %v45_v10  ;;  %70 = vadd.xlane.f32.xlu1 %v69_v11 }
   0xf   :  { %49 = vadd.xlane.f32.xlu0 %v48_v14  ;;  %73 = vadd.xlane.f32.xlu1 %v72_v15 }
  0x13   :  { %52 = vadd.xlane.f32.xlu0 %v51_v18  ;;  %76 = vadd.xlane.f32.xlu1 %v75_v19 }
  0x17   :  { %55 = vadd.xlane.f32.xlu0 %v54_v22  ;;  %79 = vadd.xlane.f32.xlu1 %v78_v23 }
  0x1b   :  { %58 = vadd.xlane.f32.xlu0 %v57_v26  ;;  %82 = vadd.xlane.f32.xlu1 %v81_v27 }
  0x1f   :  { %61 = vadd.xlane.f32.xlu0 %v60_v30  ;;  %85 = vadd.xlane.f32.xlu1 %v84_v31 }
  0x90   :  { %v41_v32 = vpop.xlane.xlu0 %40  ;;  %v44_v33 = vpop.xlane.xlu1 %43 }
  0x91   :  { %v88_v34 = vmul.f32 0.03125, %v41_v32  ;;  %v89_v35 = vmul.f32 0.03125, %v44_v33 }
  0x93   :  { %v756_v36 = vsub.f32 %v20_v0, %v88_v34  ;;  %v758_v37 = vsub.f32 %v21_v1, %v89_v35 }
  0x94   :  { %v65_v38 = vpop.xlane.xlu0 %64  ;;  %v68_v39 = vpop.xlane.xlu1 %67 }
  0x95   :  { %v96_v40 = vmul.f32 0.03125, %v65_v38  ;;  %v97_v41 = vmul.f32 0.03125, %v68_v39  ;;  %v120_v42 = vmul.f32 %v756_v36, %v756_v36  ;;  %v121_v43 = vmul.f32 %v758_v37, %v758_v37 }
  0x97   :  { %v764_v44 = vsub.f32 %v28_v2, %v96_v40  ;;  %v766_v45 = vsub.f32 %v29_v5, %v97_v41  ;;  %v136_v46 = vsel %vm38_vm0, %v120_v42, 0.0  ;;  %v139_v49 = vsel %vm38_vm0, %v121_v43, 0.0 }
  0x98   :  { %137 = vadd.xlane.f32.xlu0 %v136_v46  ;;  %v47_v47 = vpop.xlane.xlu0 %46  ;;  %v71_v48 = vpop.xlane.xlu1 %70 }
  0x99   :  { %v90_v50 = vmul.f32 0.03125, %v47_v47  ;;  %v98_v51 = vmul.f32 0.03125, %v71_v48  ;;  %v128_v52 = vmul.f32 %v764_v44, %v764_v44  ;;  %v129_v53 = vmul.f32 %v766_v45, %v766_v45 }
  0x9b   :  { %v774_v54 = vsub.f32 %v22_v8, %v90_v50  ;;  %v776_v55 = vsub.f32 %v30_v9, %v98_v51  ;;  %v160_v56 = vsel %vm38_vm0, %v128_v52, 0.0  ;;  %v163_v59 = vsel %vm38_vm0, %v129_v53, 0.0  ;;  %v293_v53 = vld [vmem:[%s1000_s3 + $0x8] sm:$0xff] }
  0x9c   :  { %140 = vadd.xlane.f32.xlu0 %v139_v49  ;;  %161 = vadd.xlane.f32.xlu1 %v160_v56  ;;  %v50_v57 = vpop.xlane.xlu0 %49  ;;  %v74_v58 = vpop.xlane.xlu1 %73 }
  0x9d   :  { %v91_v60 = vmul.f32 0.03125, %v50_v57  ;;  %v99_v61 = vmul.f32 0.03125, %v74_v58  ;;  %v122_v62 = vmul.f32 %v774_v54, %v774_v54  ;;  %v130_v63 = vmul.f32 %v776_v55, %v776_v55  ;;  %v294_v57 = vld [vmem:[%s1000_s3 + $0x10] sm:$0xff]  ;;  %v295_v58 = vld [vmem:[%s1000_s3 + $0x18] sm:$0xff] }
  0x9f   :  { %v785_v0 = vsub.f32 %v689_v12, %v91_v60  ;;  %v788_v1 = vsub.f32 %v694_v13, %v99_v61  ;;  %v142_v2 = vsel %vm38_vm0, %v122_v62, 0.0  ;;  %v166_v5 = vsel %vm38_vm0, %v130_v63, 0.0 }
  0xa0   :  { %164 = vadd.xlane.f32.xlu1 %v163_v59  ;;  %143 = vadd.xlane.f32.xlu0 %v142_v2  ;;  %v53_v3 = vpop.xlane.xlu0 %52  ;;  %v77_v4 = vpop.xlane.xlu1 %76  ;;  %v592_v59 = vpack.c.bf16 %v295_v58, %v294_v57 }
  0xa1   :  { %v92_v6 = vmul.f32 0.03125, %v53_v3  ;;  %v100_v7 = vmul.f32 0.03125, %v77_v4  ;;  %v123_v8 = vmul.f32 %v785_v0, %v785_v0  ;;  %v131_v9 = vmul.f32 %v788_v1, %v788_v1 }
  0xa3   :  { %v797_v10 = vsub.f32 %v703_v16, %v92_v6  ;;  %v800_v11 = vsub.f32 %v708_v17, %v100_v7  ;;  %v145_v12 = vsel %vm38_vm0, %v123_v8, 0.0  ;;  %v169_v15 = vsel %vm38_vm0, %v131_v9, 0.0 }
  0xa4   :  { %167 = vadd.xlane.f32.xlu1 %v166_v5  ;;  %146 = vadd.xlane.f32.xlu0 %v145_v12  ;;  %v56_v13 = vpop.xlane.xlu0 %55  ;;  %v80_v14 = vpop.xlane.xlu1 %79 }
  0xa5   :  { %v93_v18 = vmul.f32 0.03125, %v56_v13  ;;  %v101_v19 = vmul.f32 0.03125, %v80_v14  ;;  %v124_v22 = vmul.f32 %v797_v10, %v797_v10  ;;  %v132_v16 = vmul.f32 %v800_v11, %v800_v11 }
  0xa7   :  { %v809_v23 = vsub.f32 %v717_v20, %v93_v18  ;;  %v812_v17 = vsub.f32 %v722_v21, %v101_v19  ;;  %v148_v26 = vsel %vm38_vm0, %v124_v22, 0.0  ;;  %v172_v31 = vsel %vm38_vm0, %v132_v16, 0.0 }
  0xa8   :  { %170 = vadd.xlane.f32.xlu1 %v169_v15  ;;  %149 = vadd.xlane.f32.xlu0 %v148_v26  ;;  %v59_v27 = vpop.xlane.xlu0 %58  ;;  %v83_v30 = vpop.xlane.xlu1 %82 }
  0xa9   :  { %v94_v32 = vmul.f32 0.03125, %v59_v27  ;;  %v102_v33 = vmul.f32 0.03125, %v83_v30  ;;  %v125_v34 = vmul.f32 %v809_v23, %v809_v23  ;;  %v133_v20 = vmul.f32 %v812_v17, %v812_v17  ;;  %v861_v30 = vld [vmem:[%s1001_s1] ss:$0 sm:$0xff] }
  0xab   :  { %v821_v35 = vsub.f32 %v731_v24, %v94_v32  ;;  %v824_v21 = vsub.f32 %v736_v25, %v102_v33  ;;  %v151_v38 = vsel %vm38_vm0, %v125_v34, 0.0  ;;  %v175_v41 = vsel %vm38_vm0, %v133_v20, 0.0 }
  0xac   :  { %173 = vadd.xlane.f32.xlu1 %v172_v31  ;;  %152 = vadd.xlane.f32.xlu0 %v151_v38  ;;  %v62_v39 = vpop.xlane.xlu0 %61  ;;  %v86_v40 = vpop.xlane.xlu1 %85  ;;  %v867_v38 = vld [vmem:[%s1002_s2] ss:$0 sm:$0xff] }
  0xad   :  { %v95_v42 = vmul.f32 0.03125, %v62_v39  ;;  %v103_v43 = vmul.f32 0.03125, %v86_v40  ;;  %v126_v46 = vmul.f32 %v821_v35, %v821_v35  ;;  %v134_v24 = vmul.f32 %v824_v21, %v824_v21 }
  0xaf   :  { %v833_v47 = vsub.f32 %v745_v28, %v95_v42  ;;  %v836_v25 = vsub.f32 %v750_v29, %v103_v43  ;;  %v154_v48 = vsel %vm38_vm0, %v126_v46, 0.0  ;;  %v178_v49 = vsel %vm38_vm0, %v134_v24, 0.0  ;;  %v292_v29 = vld [vmem:[%s1000_s3] sm:$0xff] }
  0xb0   :  { %176 = vadd.xlane.f32.xlu1 %v175_v41  ;;  %155 = vadd.xlane.f32.xlu0 %v154_v48  ;;  %v588_v56 = vpack.c.bf16 %v293_v53, %v292_v29 }
  0xb1   :  { %v127_v50 = vmul.f32 %v833_v47, %v833_v47  ;;  %v135_v51 = vmul.f32 %v836_v25, %v836_v25 }
  0xb2   :  { %589 = vmatprep.subr.bf16.mxu0 %v588_v56  ;;  %596 = vmatprep.subr.bf16.mxu1 %v588_v56 }
  0xb3   :  { %v157_v52 = vsel %vm38_vm0, %v127_v50, 0.0  ;;  %v181_v28 = vsel %vm38_vm0, %v135_v51, 0.0  ;;  %591 = vmatpush3.bf16.msra.mxu0 %v588_v56  ;;  %598 = vmatpush3.bf16.msra.mxu1 %v588_v56 }
  0xb4   :  { %179 = vadd.xlane.f32.xlu1 %v178_v49  ;;  %158 = vadd.xlane.f32.xlu0 %v157_v52 }
  0xb5   :  { %593 = vmatprep.subr.bf16.mxu0 %v592_v59  ;;  %597 = vmatprep.subr.bf16.mxu1 %v592_v59 }
  0xb7   :  { %595 = vmatpush3.bf16.msra.mxu0 %v592_v59  ;;  %599 = vmatpush3.bf16.msra.mxu1 %v592_v59 }
  0xb8   :  { %182 = vadd.xlane.f32.xlu1 %v181_v28 }
 0x125   :  { %v138_v60 = vpop.xlane.xlu0 %137 }
 0x126   :  { %v184_v61 = vmul.f32 0.03125, %v138_v60 }
 0x128   :  { %v200_v62 = vadd.f32 1e-05, %v184_v61 }
 0x129   :  { %v162_v63 = vpop.xlane.xlu1 %161  ;;  %v141_v2 = vpop.xlane.xlu0 %140 }
 0x12a   :  { %600 = vrsqrt.f32 %v200_v62  ;;  %v192_v3 = vmul.f32 0.03125, %v162_v63  ;;  %v185_v4 = vmul.f32 0.03125, %v141_v2 }
 0x12c   :  { %v208_v5 = vadd.f32 1e-05, %v192_v3  ;;  %v201_v6 = vadd.f32 1e-05, %v185_v4 }
 0x12d   :  { %v165_v7 = vpop.xlane.xlu1 %164  ;;  %v144_v8 = vpop.xlane.xlu0 %143 }
 0x12e   :  { %602 = vrsqrt.f32 %v208_v5  ;;  %v193_v9 = vmul.f32 0.03125, %v165_v7  ;;  %v186_v12 = vmul.f32 0.03125, %v144_v8 }
 0x12f   :  { %604 = vrsqrt.f32 %v201_v6 }
 0x130   :  { %v209_v13 = vadd.f32 1e-05, %v193_v9  ;;  %v202_v14 = vadd.f32 1e-05, %v186_v12 }
 0x131   :  { %v168_v15 = vpop.xlane.xlu1 %167  ;;  %v147_v18 = vpop.xlane.xlu0 %146 }
 0x132   :  { %606 = vrsqrt.f32 %v209_v13  ;;  %v194_v19 = vmul.f32 0.03125, %v168_v15  ;;  %v187_v22 = vmul.f32 0.03125, %v147_v18 }
 0x133   :  { %608 = vrsqrt.f32 %v202_v14 }
 0x134   :  { %v601_v16 = vpop.eup %600  ;;  %v210_v26 = vadd.f32 1e-05, %v194_v19  ;;  %v203_v27 = vadd.f32 1e-05, %v187_v22 }
 0x135   :  { %v171_v31 = vpop.xlane.xlu1 %170  ;;  %v150_v32 = vpop.xlane.xlu0 %149  ;;  %v232_v33 = vmul.f32 %v601_v16, %v756_v36 }
 0x136   :  { %610 = vrsqrt.f32 %v210_v26  ;;  %v195_v34 = vmul.f32 0.03125, %v171_v31  ;;  %v188_v20 = vmul.f32 0.03125, %v150_v32 }
 0x137   :  { %612 = vrsqrt.f32 %v203_v27  ;;  %v254_v39 = vmul.f32 %v861_v30, %v232_v33 }
 0x138   :  { %v603_v40 = vpop.eup %602  ;;  %v211_v41 = vadd.f32 1e-05, %v195_v34  ;;  %v204_v42 = vadd.f32 1e-05, %v188_v20 }
 0x139   :  { %v605_v43 = vpop.eup %604  ;;  %v174_v46 = vpop.xlane.xlu1 %173  ;;  %v276_v48 = vadd.f32 %v867_v38, %v254_v39  ;;  %v240_v36 = vmul.f32 %v603_v40, %v764_v44 }
 0x13a   :  { %v153_v24 = vpop.xlane.xlu0 %152  ;;  %614 = vrsqrt.f32 %v211_v41  ;;  %v196_v49 = vmul.f32 0.03125, %v174_v46  ;;  %v233_v51 = vmul.f32 %v605_v43, %v758_v37 }
 0x13b   :  { %v189_v50 = vmul.f32 0.03125, %v153_v24  ;;  %616 = vrsqrt.f32 %v204_v42  ;;  %564 = vmatprep.mubr.msk.f32.mxu0 %vm38_vm0, %v276_v48  ;;  %v262_v52 = vmul.f32 %v861_v30, %v240_v36 }
 0x13c   :  { %v607_v28 = vpop.eup %606  ;;  %v212_v29 = vadd.f32 1e-05, %v196_v49  ;;  %v255_v56 = vmul.f32 %v861_v30, %v233_v51 }
 0x13d   :  { %v205_v53 = vadd.f32 1e-05, %v189_v50  ;;  %v609_v57 = vpop.eup %608  ;;  %v177_v58 = vpop.xlane.xlu1 %176  ;;  %v284_v44 = vadd.f32 %v867_v38, %v262_v52  ;;  %v241_v60 = vmul.f32 %v607_v28, %v766_v45 }
 0x13e   :  { %v156_v59 = vpop.xlane.xlu0 %155  ;;  %618 = vrsqrt.f32 %v212_v29  ;;  %v197_v61 = vmul.f32 0.03125, %v177_v58  ;;  %v277_v62 = vadd.f32 %v867_v38, %v255_v56  ;;  %v234_v63 = vmul.f32 %v609_v57, %v774_v54 }
 0x13f   :  { %v190_v37 = vmul.f32 0.03125, %v156_v59  ;;  %620 = vrsqrt.f32 %v205_v53  ;;  %576 = vmatprep.mubr.msk.f32.mxu1 %vm38_vm0, %v284_v44  ;;  %v263_v2 = vmul.f32 %v861_v30, %v241_v60 }
 0x140   :  { %v611_v3 = vpop.eup %610  ;;  %v213_v4 = vadd.f32 1e-05, %v197_v61  ;;  %565 = vmatmul.mubr.msk.f32.vlgmr.msra.gmra.mrb[0].mxu0 %vm38_vm0, %v277_v62  ;;  %v256_v8 = vmul.f32 %v861_v30, %v234_v63  ;;  %v519_v62 = vld [vmem:[%s1003_s4] ss:$0 sm:$0xff] }
 0x141   :  { %v206_v5 = vadd.f32 1e-05, %v190_v37  ;;  %v613_v6 = vpop.eup %612  ;;  %v180_v7 = vpop.xlane.xlu1 %179  ;;  %v285_v9 = vadd.f32 %v867_v38, %v263_v2  ;;  %v242_v12 = vmul.f32 %v611_v3, %v776_v55 }
 0x142   :  { %v159_v45 = vpop.xlane.xlu0 %158  ;;  %622 = vrsqrt.f32 %v213_v4  ;;  %v198_v13 = vmul.f32 0.03125, %v180_v7  ;;  %v235_v54 = vmul.f32 %v613_v6, %v785_v0  ;;  %v278_v15 = vadd.f32 %v867_v38, %v256_v8 }
 0x143   :  { %v191_v14 = vmul.f32 0.03125, %v159_v45  ;;  %624 = vrsqrt.f32 %v206_v5  ;;  %577 = vmatmul.mubr.msk.f32.vlgmr.msra.gmra.mrb[0].mxu1 %vm38_vm0, %v285_v9  ;;  %v264_v18 = vmul.f32 %v861_v30, %v242_v12 }
 0x144   :  { %v615_v19 = vpop.eup %614  ;;  %v214_v22 = vadd.f32 1e-05, %v198_v13  ;;  %v257_v26 = vmul.f32 %v861_v30, %v235_v54  ;;  %567 = vmatprep.mubr.msk.f32.mxu0 %vm38_vm0, %v278_v15 }
 0x145   :  { %v207_v16 = vadd.f32 1e-05, %v191_v14  ;;  %v617_v27 = vpop.eup %616  ;;  %v183_v55 = vpop.xlane.xlu1 %182  ;;  %v286_v31 = vadd.f32 %v867_v38, %v264_v18  ;;  %v243_v0 = vmul.f32 %v615_v19, %v788_v1 }
 0x146   :  { %626 = vrsqrt.f32 %v214_v22  ;;  %v199_v32 = vmul.f32 0.03125, %v183_v55  ;;  %v279_v33 = vadd.f32 %v867_v38, %v257_v26  ;;  %v236_v34 = vmul.f32 %v617_v27, %v797_v10 }
 0x147   :  { %628 = vrsqrt.f32 %v207_v16  ;;  %579 = vmatprep.mubr.msk.f32.mxu1 %vm38_vm0, %v286_v31  ;;  %v265_v20 = vmul.f32 %v861_v30, %v243_v0 }
 0x148   :  { %v619_v39 = vpop.eup %618  ;;  %v215_v40 = vadd.f32 1e-05, %v199_v32  ;;  %568 = vmatmul.mubr.msk.f32.gmra.mrb[2].mxu0 %vm38_vm0, %v279_v33  ;;  %v258_v41 = vmul.f32 %v861_v30, %v236_v34 }
 0x149   :  { %v621_v42 = vpop.eup %620  ;;  %v287_v1 = vadd.f32 %v867_v38, %v265_v20  ;;  %v244_v43 = vmul.f32 %v619_v39, %v800_v11 }
 0x14a   :  { %630 = vrsqrt.f32 %v215_v40  ;;  %v280_v46 = vadd.f32 %v867_v38, %v258_v41  ;;  %v237_v10 = vmul.f32 %v621_v42, %v809_v23 }
 0x14b   :  { %580 = vmatmul.mubr.msk.f32.gmra.mrb[2].mxu1 %vm38_vm0, %v287_v1  ;;  %v266_v24 = vmul.f32 %v861_v30, %v244_v43 }
 0x14c   :  { %v623_v48 = vpop.eup %622  ;;  %570 = vmatprep.mubr.msk.f32.mxu0 %vm38_vm0, %v280_v46  ;;  %v259_v36 = vmul.f32 %v861_v30, %v237_v10 }
 0x14d   :  { %v625_v49 = vpop.eup %624  ;;  %v288_v50 = vadd.f32 %v867_v38, %v266_v24  ;;  %v245_v51 = vmul.f32 %v623_v48, %v812_v17 }
 0x14e   :  { %v281_v11 = vadd.f32 %v867_v38, %v259_v36  ;;  %v238_v52 = vmul.f32 %v625_v49, %v821_v35 }
 0x14f   :  { %582 = vmatprep.mubr.msk.f32.mxu1 %vm38_vm0, %v288_v50  ;;  %v267_v23 = vmul.f32 %v861_v30, %v245_v51 }
 0x150   :  { %v627_v28 = vpop.eup %626  ;;  %571 = vmatmul.mubr.msk.f32.gmra.mrb[4].mxu0 %vm38_vm0, %v281_v11  ;;  %v260_v29 = vmul.f32 %v861_v30, %v238_v52 }
 0x151   :  { %v629_v53 = vpop.eup %628  ;;  %v289_v56 = vadd.f32 %v867_v38, %v267_v23  ;;  %v246_v57 = vmul.f32 %v627_v28, %v824_v21 }
 0x152   :  { %v282_v17 = vadd.f32 %v867_v38, %v260_v29  ;;  %v239_v58 = vmul.f32 %v629_v53, %v833_v47 }
 0x153   :  { %583 = vmatmul.mubr.msk.f32.gmra.mrb[4].mxu1 %vm38_vm0, %v289_v56  ;;  %v268_v35 = vmul.f32 %v861_v30, %v246_v57 }
 0x154   :  { %v631_v59 = vpop.eup %630  ;;  %573 = vmatprep.mubr.msk.f32.mxu0 %vm38_vm0, %v282_v17  ;;  %v261_v44 = vmul.f32 %v861_v30, %v239_v58 }
 0x155   :  { %v290_v60 = vadd.f32 %v867_v38, %v268_v35  ;;  %v247_v61 = vmul.f32 %v631_v59, %v836_v25 }
 0x156   :  { %v283_v37 = vadd.f32 %v867_v38, %v261_v44 }
 0x157   :  { %585 = vmatprep.mubr.msk.f32.mxu1 %vm38_vm0, %v290_v60  ;;  %v269_v21 = vmul.f32 %v861_v30, %v247_v61 }
 0x158   :  { %574 = vmatmul.mubr.msk.f32.gmra.mrb[6].mxu0 %vm38_vm0, %v283_v37 }
 0x159   :  { %v291_v47 = vadd.f32 %v867_v38, %v269_v21 }
 0x15b   :  { %586 = vmatmul.mubr.msk.f32.gmra.mrb[6].mxu1 %vm38_vm0, %v291_v47 }
 0x213   :  { %v566_v63 = vpop.f32.mrb[0].mxu0 }
 0x214   :  { %v423_v2 = vadd.f32 %v566_v63, %v519_v62  ;;  %v417_v25 = vpop.f32.mrb[1].mxu0 }
 0x215   :  { %v418_v3 = vadd.f32 %v519_v62, %v417_v25 }
 0x216   :  { %498 = vst.msk [vmem:[%s1004_s5 + $0x8] sm:$0xff] %vm496_vm1, %v423_v2  ;;  %v578_v30 = vpop.f32.mrb[0].mxu1 }
 0x217   :  { %497 = vst.msk [vmem:[%s1004_s5] sm:$0xff] %vm496_vm1, %v418_v3  ;;  %v463_v38 = vadd.f32 %v578_v30, %v519_v62  ;;  %v457_v4 = vpop.f32.mrb[1].mxu1 }
 0x218   :  { %v458_v5 = vadd.f32 %v519_v62, %v457_v4 }
 0x219   :  { %506 = vst.msk [vmem:[%s1004_s5 + $0x48] sm:$0xff] %vm496_vm1, %v463_v38 }
 0x21a   :  { %505 = vst.msk [vmem:[%s1004_s5 + $0x40] sm:$0xff] %vm496_vm1, %v458_v5 }
 0x21b   :  { %v569_v6 = vpop.f32.mrb[2].mxu0 }
 0x21c   :  { %v433_v7 = vadd.f32 %v569_v6, %v519_v62  ;;  %v427_v45 = vpop.f32.mrb[3].mxu0 }
 0x21d   :  { %v428_v8 = vadd.f32 %v519_v62, %v427_v45 }
 0x21e   :  { %500 = vst.msk [vmem:[%s1004_s5 + $0x18] sm:$0xff] %vm496_vm1, %v433_v7  ;;  %v581_v9 = vpop.f32.mrb[2].mxu1 }
 0x21f   :  { %499 = vst.msk [vmem:[%s1004_s5 + $0x10] sm:$0xff] %vm496_vm1, %v428_v8  ;;  %v473_v12 = vadd.f32 %v581_v9, %v519_v62  ;;  %v467_v13 = vpop.f32.mrb[3].mxu1 }
 0x220   :  { %v468_v14 = vadd.f32 %v519_v62, %v467_v13 }
 0x221   :  { %508 = vst.msk [vmem:[%s1004_s5 + $0x58] sm:$0xff] %vm496_vm1, %v473_v12 }
 0x222   :  { %507 = vst.msk [vmem:[%s1004_s5 + $0x50] sm:$0xff] %vm496_vm1, %v468_v14 }
 0x223   :  { %v572_v54 = vpop.f32.mrb[4].mxu0 }
 0x224   :  { %v443_v15 = vadd.f32 %v572_v54, %v519_v62  ;;  %v437_v18 = vpop.f32.mrb[5].mxu0 }
 0x225   :  { %v438_v19 = vadd.f32 %v519_v62, %v437_v18 }
 0x226   :  { %502 = vst.msk [vmem:[%s1004_s5 + $0x28] sm:$0xff] %vm496_vm1, %v443_v15  ;;  %v584_v22 = vpop.f32.mrb[4].mxu1 }
 0x227   :  { %501 = vst.msk [vmem:[%s1004_s5 + $0x20] sm:$0xff] %vm496_vm1, %v438_v19  ;;  %v483_v16 = vadd.f32 %v584_v22, %v519_v62  ;;  %v477_v26 = vpop.f32.mrb[5].mxu1 }
 0x228   :  { %v478_v27 = vadd.f32 %v519_v62, %v477_v26 }
 0x229   :  { %510 = vst.msk [vmem:[%s1004_s5 + $0x68] sm:$0xff] %vm496_vm1, %v483_v16 }
 0x22a   :  { %509 = vst.msk [vmem:[%s1004_s5 + $0x60] sm:$0xff] %vm496_vm1, %v478_v27 }
 0x22b   :  { %v575_v55 = vpop.f32.mrb[6].mxu0 }
 0x22c   :  { %v453_v31 = vadd.f32 %v575_v55, %v519_v62  ;;  %v447_v0 = vpop.f32.mrb[7].mxu0 }
 0x22d   :  { %v448_v32 = vadd.f32 %v519_v62, %v447_v0 }
 0x22e   :  { %504 = vst.msk [vmem:[%s1004_s5 + $0x38] sm:$0xff] %vm496_vm1, %v453_v31  ;;  %v587_v33 = vpop.f32.mrb[6].mxu1 }
 0x22f   :  { %503 = vst.msk [vmem:[%s1004_s5 + $0x30] sm:$0xff] %vm496_vm1, %v448_v32  ;;  %v493_v34 = vadd.f32 %v587_v33, %v519_v62  ;;  %v487_v20 = vpop.f32.mrb[7].mxu1 }
 0x230   :  { %v488_v39 = vadd.f32 %v519_v62, %v487_v20 }
 0x231   :  { %512 = vst.msk [vmem:[%s1004_s5 + $0x78] sm:$0xff] %vm496_vm1, %v493_v34 }
 0x232   :  { %511 = vst.msk [vmem:[%s1004_s5 + $0x70] sm:$0xff] %vm496_vm1, %v488_v39 }

</bundles_post_ra>
